<compile_context>
chip_gen: v7x
topology: tpu7x:2x2x1
jax: 0.10.0
libtpu: 0.0.40
codegen_flags: <defaults>
</compile_context>

<pallas_src>
import jax
import jax.numpy as jnp
from jax.experimental import pallas as pl
from jax.experimental.pallas import tpu as pltpu


def _downstream_kernel(latents_ref, context_ref, wl_ref, bl_ref, wc_ref, bc_ref,
                       out_ref):
    s = pl.program_id(1)

    # ---- init: out_ref doubles as the running-max accumulator (resident over S) ----
    @pl.when(s == 0)
    def _init():
        out_ref[...] = jnp.full(out_ref.shape, -jnp.inf, dtype=out_ref.dtype)

    # ---- latent branch for this (TS, TB) tile: ReLU -> ONE fused MXU matmul ----
    ts, tb, l = latents_ref.shape
    o_pad = out_ref.shape[-1]
    lat = jnp.maximum(latents_ref[...].astype(jnp.float32), 0.0)   # upcast then ReLU (v5e-safe)
    lat = lat.reshape(ts * tb, l)                                  # 8-aligned merge (TB % 8 == 0)
    part = jnp.dot(lat, wl_ref[...], preferred_element_type=jnp.float32)   # (TS*TB, O_pad)
    part = part.reshape(ts, tb, o_pad).max(axis=0)                 # max over the TS sub-blocks
    out_ref[...] = jnp.maximum(out_ref[...], part)

    # ---- finalize on the last S step: bias-after-max, context branch, sigmoid ----
    @pl.when(s == pl.num_programs(1) - 1)
    def _finalize():
        predl = out_ref[...] + bl_ref[...]                         # bias after max (bias const in S)
        ctx = jnp.maximum(context_ref[...].astype(jnp.float32), 0.0)
        predc = jnp.dot(ctx, wc_ref[...],
                        preferred_element_type=jnp.float32) + bc_ref[...]
        pred = (predc + predl) * 0.5
        # sigmoid(x) = 0.5*(tanh(x/2)+1): keeps the transcendental on the EUP, no divide.
        out_ref[...] = (0.5 * jnp.tanh(pred * 0.5) + 0.5).astype(out_ref.dtype)


def _round_up(x, m):
    return pl.cdiv(x, m) * m


def _pick_tb(b_pad):
    """Batch tile: multiple-of-8 divisor of b_pad, <=128 rows, prefer >=2 tiles (v7x)."""
    cands = [t for t in range(8, min(b_pad, 128) + 1, 8) if b_pad % t == 0]
    multi = [t for t in cands if b_pad // t >= 2]
    return (multi or cands)[-1]


def _pick_ts(S, tb, L, o_pad, itemsize):
    """S-steps fused per grid step: largest divisor of S whose block fits the budget."""
    # Per-row VMEM cost: double-buffered latents block + f32 ReLU copy (lane-padded
    # to 128) + the (rows, O_pad) f32 matmul intermediate + its max temp.  ~8 MiB
    # budget keeps the kernel inside v5e's 16 MiB scoped-VMEM default untouched
    # (v6e/v7x default 32 MiB; v7x physical VMEM is 64 MiB).
    row_bytes = 2 * max(L, 128) * itemsize + max(L, 128) * 4 + 2 * o_pad * 4
    max_rows = max(tb, (8 << 20) // row_bytes)
    ts_cap = max(1, min(S, max_rows // tb))
    ts = 1
    for d in range(1, ts_cap + 1):      # TODO(synk): mask a ragged last S tile instead
        if S % d == 0:                  # of requiring a divisor (matters for prime S).
            ts = d
    return ts


def downstream_linear_net(latents, context, wl, bl, wc, bc):
    """latents: (S, B, L); context: (B, C); wl: (L, O); bl: (1, O); wc: (C, O); bc: (1, O).

    Weights are stored (in_features, out_features), i.e. transposed vs torch Linear.weight,
    so the kernel computes x @ W + b (== PyTorch x @ W.T + b).
    """
    S, B, L = latents.shape
    C = context.shape[-1]
    O = wl.shape[-1]
    f32 = jnp.float32

    O_pad = _round_up(O, 128)            # lane-dense output columns
    B_pad = _round_up(B, 8)              # sublane-aligned batch
    TB = _pick_tb(B_pad)

    # Pad/cast only the tiny weights & biases (zero padding of extra output columns is
    # semantically inert: those columns are sliced off).  The big latents/context streams
    # are passed through untouched in their native dtype.
    wl_p = jnp.zeros((L, O_pad), f32).at[:, :O].set(wl.astype(f32))
    bl_p = jnp.zeros((1, O_pad), f32).at[:, :O].set(bl.reshape(1, O).astype(f32))
    wc_p = jnp.zeros((C, O_pad), f32).at[:, :O].set(wc.astype(f32))
    bc_p = jnp.zeros((1, O_pad), f32).at[:, :O].set(bc.reshape(1, O).astype(f32))

    if B_pad != B:
        # Only hit when B % 8 != 0 (ragged sublane tile).  Zero rows give finite values
        # that are sliced off below.
        # TODO(synk): mask the ragged batch tail in-kernel to avoid this pad copy.
        latents = jnp.zeros((S, B_pad, L), latents.dtype).at[:, :B, :].set(latents)
        context = jnp.zeros((B_pad, C), context.dtype).at[:B, :].set(context)

    TS = _pick_ts(S, TB, L, O_pad, latents.dtype.itemsize)
    grid = (B_pad // TB, S // TS)
    # TODO(synk): on v7x, when B_pad // TB == 1, split S into two "parallel" chunks
    # (partial running-max outputs + tiny XLA epilogue) so both TensorCores get work.

    out_padded = pl.pallas_call(
        _downstream_kernel,
        out_shape=jax.ShapeDtypeStruct((B_pad, O_pad), f32),
        grid_spec=pltpu.PrefetchScalarGridSpec(
            num_scalar_prefetch=0,
            grid=grid,
            in_specs=[
                # latents: (TS, TB, L) tile streamed along the S (reduction-last) axis
                pl.BlockSpec((TS, TB, L), lambda b, s: (s, b, 0)),
                # context: one (TB, C) tile per batch tile, resident across S
                pl.BlockSpec((TB, C), lambda b, s: (b, 0)),
                # weights / biases: resident across the whole grid
                pl.BlockSpec((L, O_pad), lambda b, s: (0, 0)),
                pl.BlockSpec((1, O_pad), lambda b, s: (0, 0)),
                pl.BlockSpec((C, O_pad), lambda b, s: (0, 0)),
                pl.BlockSpec((1, O_pad), lambda b, s: (0, 0)),
            ],
            out_specs=pl.BlockSpec((TB, O_pad), lambda b, s: (b, 0)),
        ),
        compiler_params=pltpu.CompilerParams(
            dimension_semantics=("parallel", "arbitrary")),
    )(latents, context, wl_p, bl_p, wc_p, bc_p)

    return out_padded[:B, :O]


def _reference(latents, context, wl, bl, wc, bc):
    """Pure-JAX reference of the PyTorch forward (f32, highest matmul precision)."""
    predl = jnp.einsum("sbl,lo->sbo", jax.nn.relu(latents), wl,
                       precision="highest") + bl.reshape(1, 1, -1)
    predl = jnp.max(predl, axis=0)
    predc = jnp.dot(jax.nn.relu(context), wc, precision="highest") + bc.reshape(1, -1)
    return jax.nn.sigmoid((predc + predl) / 2.0)


if __name__ == "__main__":
    key = jax.random.PRNGKey(0)
    k = jax.random.split(key, 6)
    latent_size, context_size, out_classes = 32, 32, 8

    def make_inputs(S, B, latents_dtype):
        latents = jax.random.normal(k[0], (S, B, latent_size), jnp.float32).astype(latents_dtype)
        context = jax.random.normal(k[1], (B, context_size), jnp.float32)
        wl = 0.1 * jax.random.normal(k[2], (latent_size, out_classes), jnp.float32)
        bl = 0.1 * jax.random.normal(k[3], (1, out_classes), jnp.float32)
        wc = 0.1 * jax.random.normal(k[4], (context_size, out_classes), jnp.float32)
        bc = 0.1 * jax.random.normal(k[5], (1, out_classes), jnp.float32)
        return latents, context, wl, bl, wc, bc

    # 1) Toy shapes from the module (S=8, B=2), f32 storage.  Exercises the
    #    ragged-batch pad path and a single fused grid step.
    args = make_inputs(8, 2, jnp.float32)
    out = jax.block_until_ready(downstream_linear_net(*args))
    ref = _reference(args[0].astype(jnp.float32), *args[1:])
    assert out.shape == (2, out_classes)
    assert jnp.allclose(out, ref, atol=1e-4, rtol=1e-4), "f32 mismatch vs reference"

    # 2) Larger S with bf16-stored latents.  Exercises the no-pad path, two
    #    parallel batch tiles, the multi-step running max over the S grid axis,
    #    and the halved-HBM-traffic bf16 latents stream.
    args = make_inputs(2048, 16, jnp.bfloat16)
    out = jax.block_until_ready(downstream_linear_net(*args))
    ref = _reference(args[0].astype(jnp.float32), *args[1:])
    assert out.shape == (16, out_classes)
    assert jnp.allclose(out, ref, atol=1e-3, rtol=1e-3), "bf16 mismatch vs reference"

    print("KERNEL_OK")
</pallas_src>

<mosaic_0001>
module attributes {stable_mosaic.version = 11 : i64} {
  func.func @_downstream_kernel(%arg0: i32, %arg1: i32, %arg2: memref<8x8x32xf32, #tpu.memory_space<vmem>>, %arg3: memref<8x32xf32, #tpu.memory_space<vmem>>, %arg4: memref<32x128xf32, #tpu.memory_space<vmem>>, %arg5: memref<1x128xf32, #tpu.memory_space<vmem>>, %arg6: memref<32x128xf32, #tpu.memory_space<vmem>>, %arg7: memref<1x128xf32, #tpu.memory_space<vmem>>, %arg8: memref<8x128xf32, #tpu.memory_space<vmem>>) attributes {dimension_semantics = [#tpu.dimension_semantics<parallel>, #tpu.dimension_semantics<arbitrary>], iteration_bounds = array<i64: 1, 1>, scalar_prefetch = 0 : i64, scratch_operands = 0 : i64, tpu.core_type = #tpu.core_type<tc>, window_params = [{transform_indices = @transform_0, window_bounds = array<i64: 8, 8, 32>}, {transform_indices = @transform_1, window_bounds = array<i64: 8, 32>}, {pipeline_mode = #tpu.pipeline_mode<synchronous>, transform_indices = @transform_2, window_bounds = array<i64: 32, 128>}, {pipeline_mode = #tpu.pipeline_mode<synchronous>, transform_indices = @transform_3, window_bounds = array<i64: 1, 128>}, {pipeline_mode = #tpu.pipeline_mode<synchronous>, transform_indices = @transform_4, window_bounds = array<i64: 32, 128>}, {pipeline_mode = #tpu.pipeline_mode<synchronous>, transform_indices = @transform_5, window_bounds = array<i64: 1, 128>}, {transform_indices = @transform_6, window_bounds = array<i64: 8, 128>}]} {
    %c0_i32 = arith.constant 0 : i32
    %0 = arith.cmpi eq, %arg1, %c0_i32 : i32
    %1 = arith.extui %0 : i1 to i32
    %c0_i32_0 = arith.constant 0 : i32
    %2 = arith.cmpi ne, %1, %c0_i32_0 : i32
    scf.if %2 {
      %cst_13 = arith.constant 0xFF800000 : f32
      %17 = vector.broadcast %cst_13 : f32 to vector<8x128xf32>
      %c0_14 = arith.constant 0 : index
      %c0_15 = arith.constant 0 : index
      %18 = vector.load %arg8[%c0_14, %c0_15] : memref<8x128xf32, #tpu.memory_space<vmem>>, vector<8x128xf32>
      tpu.vector_store %arg8[%c0_14, %c0_15], %17 {strides = array<i32>} : memref<8x128xf32, #tpu.memory_space<vmem>>, vector<8x128xf32>,
    } else {
    }
    %c0 = arith.constant 0 : index
    %c0_1 = arith.constant 0 : index
    %c0_2 = arith.constant 0 : index
    %3 = vector.load %arg2[%c0, %c0_1, %c0_2] : memref<8x8x32xf32, #tpu.memory_space<vmem>>, vector<8x8x32xf32>
    %cst = arith.constant 0.000000e+00 : f32
    %4 = vector.broadcast %cst : f32 to vector<8x8x32xf32>
    %5 = arith.maximumf %3, %4 : vector<8x8x32xf32>
    %6 = vector.shape_cast %5 : vector<8x8x32xf32> to vector<64x32xf32>
    %c0_3 = arith.constant 0 : index
    %c0_4 = arith.constant 0 : index
    %7 = vector.load %arg4[%c0_3, %c0_4] : memref<32x128xf32, #tpu.memory_space<vmem>>, vector<32x128xf32>
    %cst_5 = arith.constant dense<0.000000e+00> : vector<64x128xf32>
    %8 = tpu.matmul %6, %7, %cst_5 {dimension_numbers = #tpu.dot_dimension_numbers<[1], [0], [0], [1], [0, 0, 1, 1], [], []>} : vector<64x32xf32>, vector<32x128xf32>, vector<64x128xf32> -> vector<64x128xf32>
    %9 = vector.shape_cast %8 : vector<64x128xf32> to vector<8x8x128xf32>
    %cst_6 = arith.constant dense<0xFF800000> : vector<8x128xf32>
    %10 = vector.multi_reduction <maximumf>, %9, %cst_6 [0] : vector<8x8x128xf32> to vector<8x128xf32>
    %c0_7 = arith.constant 0 : index
    %c0_8 = arith.constant 0 : index
    %11 = vector.load %arg8[%c0_7, %c0_8] : memref<8x128xf32, #tpu.memory_space<vmem>>, vector<8x128xf32>
    %12 = arith.maximumf %11, %10 : vector<8x128xf32>
    %c0_9 = arith.constant 0 : index
    %c0_10 = arith.constant 0 : index
    %13 = vector.load %arg8[%c0_9, %c0_10] : memref<8x128xf32, #tpu.memory_space<vmem>>, vector<8x128xf32>
    tpu.vector_store %arg8[%c0_9, %c0_10], %12 {strides = array<i32>} : memref<8x128xf32, #tpu.memory_space<vmem>>, vector<8x128xf32>,
    %c0_i32_11 = arith.constant 0 : i32
    %14 = arith.cmpi eq, %arg1, %c0_i32_11 : i32
    %15 = arith.extui %14 : i1 to i32
    %c0_i32_12 = arith.constant 0 : i32
    %16 = arith.cmpi ne, %15, %c0_i32_12 : i32
    scf.if %16 {
      %c0_13 = arith.constant 0 : index
      %c0_14 = arith.constant 0 : index
      %17 = vector.load %arg8[%c0_13, %c0_14] : memref<8x128xf32, #tpu.memory_space<vmem>>, vector<8x128xf32>
      %c0_15 = arith.constant 0 : index
      %c0_16 = arith.constant 0 : index
      %18 = vector.load %arg5[%c0_15, %c0_16] : memref<1x128xf32, #tpu.memory_space<vmem>>, vector<1x128xf32>
      %19 = vector.broadcast %18 : vector<1x128xf32> to vector<8x128xf32>
      %20 = arith.addf %17, %19 : vector<8x128xf32>
      %c0_17 = arith.constant 0 : index
      %c0_18 = arith.constant 0 : index
      %21 = vector.load %arg3[%c0_17, %c0_18] : memref<8x32xf32, #tpu.memory_space<vmem>>, vector<8x32xf32>
      %cst_19 = arith.constant 0.000000e+00 : f32
      %22 = vector.broadcast %cst_19 : f32 to vector<8x32xf32>
      %23 = arith.maximumf %21, %22 : vector<8x32xf32>
      %c0_20 = arith.constant 0 : index
      %c0_21 = arith.constant 0 : index
      %24 = vector.load %arg6[%c0_20, %c0_21] : memref<32x128xf32, #tpu.memory_space<vmem>>, vector<32x128xf32>
      %cst_22 = arith.constant dense<0.000000e+00> : vector<8x128xf32>
      %25 = tpu.matmul %23, %24, %cst_22 {dimension_numbers = #tpu.dot_dimension_numbers<[1], [0], [0], [1], [0, 0, 1, 1], [], []>} : vector<8x32xf32>, vector<32x128xf32>, vector<8x128xf32> -> vector<8x128xf32>
      %c0_23 = arith.constant 0 : index
      %c0_24 = arith.constant 0 : index
      %26 = vector.load %arg7[%c0_23, %c0_24] : memref<1x128xf32, #tpu.memory_space<vmem>>, vector<1x128xf32>
      %27 = vector.broadcast %26 : vector<1x128xf32> to vector<8x128xf32>
      %28 = arith.addf %25, %27 : vector<8x128xf32>
      %29 = arith.addf %28, %20 : vector<8x128xf32>
      %cst_25 = arith.constant 5.000000e-01 : f32
      %30 = vector.broadcast %cst_25 : f32 to vector<8x128xf32>
      %31 = arith.mulf %29, %30 : vector<8x128xf32>
      %cst_26 = arith.constant 5.000000e-01 : f32
      %32 = vector.broadcast %cst_26 : f32 to vector<8x128xf32>
      %33 = arith.mulf %31, %32 : vector<8x128xf32>
      %34 = math.tanh %33 : vector<8x128xf32>
      %cst_27 = arith.constant 5.000000e-01 : f32
      %35 = vector.broadcast %cst_27 : f32 to vector<8x128xf32>
      %36 = arith.mulf %35, %34 : vector<8x128xf32>
      %cst_28 = arith.constant 5.000000e-01 : f32
      %37 = vector.broadcast %cst_28 : f32 to vector<8x128xf32>
      %38 = arith.addf %36, %37 : vector<8x128xf32>
      %c0_29 = arith.constant 0 : index
      %c0_30 = arith.constant 0 : index
      %39 = vector.load %arg8[%c0_29, %c0_30] : memref<8x128xf32, #tpu.memory_space<vmem>>, vector<8x128xf32>
      tpu.vector_store %arg8[%c0_29, %c0_30], %38 {strides = array<i32>} : memref<8x128xf32, #tpu.memory_space<vmem>>, vector<8x128xf32>,
    } else {
    }
    return
  }
  func.func @transform_0(%arg0: i32, %arg1: i32) -> (i32, i32, i32) {
    %c0_i32 = arith.constant 0 : i32
    %c0_i32_0 = arith.constant 0 : i32
    return %arg1, %arg0, %c0_i32 : i32, i32, i32
  }
  func.func @transform_1(%arg0: i32, %arg1: i32) -> (i32, i32) {
    %c0_i32 = arith.constant 0 : i32
    %c0_i32_0 = arith.constant 0 : i32
    return %arg0, %c0_i32 : i32, i32
  }
  func.func @transform_2(%arg0: i32, %arg1: i32) -> (i32, i32) {
    %c0_i32 = arith.constant 0 : i32
    %c0_i32_0 = arith.constant 0 : i32
    %c0_i32_1 = arith.constant 0 : i32
    return %c0_i32, %c0_i32_0 : i32, i32
  }
  func.func @transform_3(%arg0: i32, %arg1: i32) -> (i32, i32) {
    %c0_i32 = arith.constant 0 : i32
    %c0_i32_0 = arith.constant 0 : i32
    %c0_i32_1 = arith.constant 0 : i32
    return %c0_i32, %c0_i32_0 : i32, i32
  }
  func.func @transform_4(%arg0: i32, %arg1: i32) -> (i32, i32) {
    %c0_i32 = arith.constant 0 : i32
    %c0_i32_0 = arith.constant 0 : i32
    %c0_i32_1 = arith.constant 0 : i32
    return %c0_i32, %c0_i32_0 : i32, i32
  }
  func.func @transform_5(%arg0: i32, %arg1: i32) -> (i32, i32) {
    %c0_i32 = arith.constant 0 : i32
    %c0_i32_0 = arith.constant 0 : i32
    %c0_i32_1 = arith.constant 0 : i32
    return %c0_i32, %c0_i32_0 : i32, i32
  }
  func.func @transform_6(%arg0: i32, %arg1: i32) -> (i32, i32) {
    %c0_i32 = arith.constant 0 : i32
    %c0_i32_0 = arith.constant 0 : i32
    return %arg0, %c0_i32 : i32, i32
  }
}

</mosaic_0001>

<bundles_post_ra>
// kernel: tpu_custom_call.1
= control target key start
LH: loop header
LB: loop body
LE: loop exit
PB: predicated region body
PF: predicated region fallthrough
CT: control target
= control target key end

     0   :  { %11 = vsyncpa [#allocation3], 0  ;;  %s711_s0 = inlined_call_operand.hbm [shape: f32[8,8,32], index: 0, kind: input, shape index: {}]   ;;  %s712_s1 = inlined_call_operand.hbm [shape: f32[8,32], index: 1, kind: input, shape index: {}]   ;;  %s713_s2 = inlined_call_operand.hbm [shape: f32[32,128], index: 2, kind: input, shape index: {}]   ;;  %s714_s3 = inlined_call_operand.vmem [shape: f32[1,128], index: 3, kind: input, shape index: {}]   ;;  %s715_s4 = inlined_call_operand.hbm [shape: f32[32,128], index: 4, kind: input, shape index: {}]   ;;  %s716_s5 = inlined_call_operand.vmem [shape: f32[1,128], index: 5, kind: input, shape index: {}]   ;;  %s717_s6 = inlined_call_operand.hbm [shape: f32[8,128], index: 6, kind: output, shape index: {}]  }
   0x1   :  { %12 = vsyncpa [#allocation6], 0 }
   0x2   :  { %13 = vsyncpa [#allocation9], 0 }
   0x3   :  { %14 = vsyncpa [#allocation4], 0  ;;  %s568_s21 = smov [#allocation5]   ;;  %s569_s23 = smov [#allocation2]  }
   0x4   :  { %s33_s22 = sshll.u32 %s568_s21, 4  ;;  %s20_s24 = sshll.u32 %s569_s23, 4  ;;  %s34_s22 = int_to_ptr.vmem [resolvable:$true] %s33_s22  ;;  %s613_s24 = int_to_ptr.vmem [resolvable:$true] %s20_s24 }
   0x5   :  { %s450_s27 = scalar_lea.hbm %s712_s1, 128 }
   0x6   :  { %p451_p0 = scmp.ne.s32.totalorder %s712_s1, %s450_s27  ;;  %p454_p1 = scmp.lt.u32.totalorder %s450_s27, %s712_s1 }
   0x8   :  { %p456_p2 = pnand %p454_p1, %p451_p0 }
   0xa   :  { %459 = shalt.err (!%p456_p2)
}
   0xb   :  { %s460_s8 = scalar_lea.vmem %s34_s22, 128  ;;  %p465_p4 = scmp.lt.s32.totalorder %s34_s22, %s34_s22 }
   0xc   :  { %p461_p3 = scmp.ne.s32.totalorder %s34_s22, %s460_s8  ;;  %p466_p5 = scmp.lt.s32.totalorder %s460_s8, %s460_s8 }
   0xe   :  { %p467_p6 = por %p466_p5, %p465_p4 }
  0x10   :  { %p468_p7 = pnand %p467_p6, %p461_p3 }
  0x12   :  { %471 = shalt.err (!%p468_p7)
}
  0x13   :  { %36 = dma.hbm_to_vmem [thread:$0]  %s712_s1, 128, %s34_s22, [#allocation6]  }
  0x14   :  { %s472_s13 = scalar_lea.hbm %s711_s0, 1024 }
  0x15   :  { %p473_p8 = scmp.ne.s32.totalorder %s711_s0, %s472_s13  ;;  %p476_p9 = scmp.lt.u32.totalorder %s472_s13, %s711_s0 }
  0x17   :  { %p478_p10 = pnand %p476_p9, %p473_p8 }
  0x19   :  { %481 = shalt.err (!%p478_p10)
}
  0x1a   :  { %s482_s18 = scalar_lea.vmem %s613_s24, 1024  ;;  %p487_p12 = scmp.lt.s32.totalorder %s613_s24, %s613_s24 }
  0x1b   :  { %p483_p11 = scmp.ne.s32.totalorder %s613_s24, %s482_s18  ;;  %p488_p13 = scmp.lt.s32.totalorder %s482_s18, %s482_s18 }
  0x1d   :  { %p489_p0 = por %p488_p13, %p487_p12 }
  0x1f   :  { %p490_p1 = pnand %p489_p0, %p483_p11 }
  0x21   :  { %493 = shalt.err (!%p490_p1)
}
  0x22   :  { %s570_s1 = smov 128   ;;  %s571_s19 = smov 8  }
  0x23   :  { %26 = dma.hbm_to_vmem [thread:$0]  %s711_s0, 1024, %s613_s24, [#allocation3], %s570_s1, %s570_s1, %s571_s19  }
  0x24   :  { %s572_s22 = smov [#allocation7]   ;;  %s573_s25 = smov [#allocation8]  }
  0x25   :  { %s42_s23 = sshll.u32 %s572_s22, 4  ;;  %s56_s26 = sshll.u32 %s573_s25, 4  ;;  %s43_s23 = int_to_ptr.vmem [resolvable:$true] %s42_s23  ;;  %s647_s26 = int_to_ptr.vmem [resolvable:$true] %s56_s26 }
  0x26   :  { %s494_s29 = scalar_lea.hbm %s713_s2, 512 }
  0x27   :  { %p495_p2 = scmp.ne.s32.totalorder %s713_s2, %s494_s29  ;;  %p498_p3 = scmp.lt.u32.totalorder %s494_s29, %s713_s2 }
  0x29   :  { %p500_p4 = pnand %p498_p3, %p495_p2 }
  0x2b   :  { %503 = shalt.err (!%p500_p4)
}
  0x2c   :  { %s504_s0 = scalar_lea.vmem %s43_s23, 512  ;;  %p509_p6 = scmp.lt.s32.totalorder %s43_s23, %s43_s23 }
  0x2d   :  { %p505_p5 = scmp.ne.s32.totalorder %s43_s23, %s504_s0  ;;  %p510_p7 = scmp.lt.s32.totalorder %s504_s0, %s504_s0 }
  0x2f   :  { %p511_p8 = por %p510_p7, %p509_p6 }
  0x31   :  { %p512_p9 = pnand %p511_p8, %p505_p5 }
  0x33   :  { %515 = shalt.err (!%p512_p9)
}
  0x34   :  { %48 = dma.hbm_to_vmem [thread:$0]  %s713_s2, 512, %s43_s23, [#allocation6], %s570_s1, %s570_s1, %s571_s19  }
  0x35   :  { %s516_s13 = scalar_lea.hbm %s715_s4, 512 }
  0x36   :  { %p517_p10 = scmp.ne.s32.totalorder %s715_s4, %s516_s13  ;;  %p520_p11 = scmp.lt.u32.totalorder %s516_s13, %s715_s4 }
  0x38   :  { %p522_p12 = pnand %p520_p11, %p517_p10 }
  0x3a   :  { %525 = shalt.err (!%p522_p12)
}
  0x3b   :  { %s526_s18 = scalar_lea.vmem %s647_s26, 512  ;;  %p531_p0 = scmp.lt.s32.totalorder %s647_s26, %s647_s26 }
  0x3c   :  { %p527_p13 = scmp.ne.s32.totalorder %s647_s26, %s526_s18  ;;  %p532_p1 = scmp.lt.s32.totalorder %s526_s18, %s526_s18 }
  0x3e   :  { %p533_p2 = por %p532_p1, %p531_p0 }
  0x40   :  { %p534_p3 = pnand %p533_p2, %p527_p13 }
  0x42   :  { %537 = shalt.err (!%p534_p3)
}
  0x43   :  { %62 = dma.hbm_to_vmem [thread:$0]  %s715_s4, 512, %s647_s26, [#allocation9], %s570_s1, %s570_s1, %s571_s19  }
  0x44   :  { %560 = dma.done.wait [#allocation3], 1024  }
  0x45   :  { %561 = vsyncadd [#allocation3], 4294966272 }
  0x46   :  { %562 = dma.done.wait [#allocation6], 640  }
  0x47   :  { %563 = vsyncadd [#allocation6], 4294966656 }
  0x48   :  { %564 = dma.done.wait [#allocation9], 512  }
  0x49   :  { %565 = vsyncadd [#allocation9], 4294966784  ;;  %v574_v0 = vmov 0.0|0.0   ;;  %vm575_vm0 = vmmov 0   ;;  %v576_v1 = vmov 0.0   ;;  %v98_v2 = vld [vmem:[#allocation7] sm:$0xff] }
  0x4a   :  { %431 = vmatprep.subr.bf16.mxu1 %v574_v0  ;;  %420 = vmatprep.mubr.msk.f32.mxu1 %vm575_vm0, %v576_v1  ;;  %v99_v3 = vld [vmem:[#allocation7 + $0x8] sm:$0xff]  ;;  %v100_v4 = vld [vmem:[#allocation7 + $0x10] sm:$0xff]  ;;  %v101_v6 = vld [vmem:[#allocation7 + $0x18] sm:$0xff]  ;;  %vm102_vm1 = vcmask 261120   ;;  %s577_s22 = smov [#allocation10]  }
  0x4b   :  { %v423_v5 = vpack.c.bf16 %v99_v3, %v98_v2  ;;  %v82_v7 = vld [vmem:[#allocation2] sm:$0xff]  ;;  %v427_v8 = vpack.c.bf16 %v101_v6, %v100_v4  ;;  %v83_v10 = vld [vmem:[#allocation2 + $0x8] sm:$0xff]  ;;  %v257_v12 = vld [vmem:[#allocation8 + $0x8] sm:$0xff]  ;;  %s353_s23 = sshll.u32 %s577_s22, 4  ;;  %s354_s23 = int_to_ptr.vmem [resolvable:$true] %s353_s23 }
  0x4c   :  { %v90_v9 = vmax.f32 %v82_v7, 0.0  ;;  %v256_v11 = vld [vmem:[#allocation8] sm:$0xff]  ;;  %v258_v13 = vld [vmem:[#allocation8 + $0x10] sm:$0xff]  ;;  %v84_v14 = vld [vmem:[#allocation2 + $0x10] sm:$0xff]  ;;  %v91_v17 = vmax.f32 %v83_v10, 0.0  ;;  %s538_s25 = scalar_lea.vmem %s354_s23, 128  ;;  %p543_p5 = scmp.lt.s32.totalorder %s354_s23, %s354_s23 }
  0x4d   :  { %424 = vmatprep.subr.bf16.mxu0 %v423_v5  ;;  %v432_v15 = vpack.c.bf16 %v257_v12, %v256_v11  ;;  %v259_v16 = vld [vmem:[#allocation8 + $0x18] sm:$0xff]  ;;  %v92_v20 = vmax.f32 %v84_v14, 0.0  ;;  %v85_v21 = vld [vmem:[#allocation2 + $0x18] sm:$0xff]  ;;  %v87_v26 = vld [vmem:[#allocation2 + $0x28] sm:$0xff]  ;;  %p539_p4 = scmp.ne.s32.totalorder %s354_s23, %s538_s25  ;;  %p544_p6 = scmp.lt.s32.totalorder %s538_s25, %s538_s25 }
  0x4e   :  { %426 = vmatpush3.bf16.msra.mxu0 %v423_v5  ;;  %400 = vmatprep.mubr.msk.f32.mxu0 %vm102_vm1, %v90_v9  ;;  %v435_v18 = vpack.c.bf16 %v259_v16, %v258_v13  ;;  %v254_v19 = vld [vmem:[#allocation5] sm:$0xff]  ;;  %v93_v24 = vmax.f32 %v85_v21, 0.0  ;;  %v88_v27 = vld [vmem:[#allocation2 + $0x30] sm:$0xff]  ;;  %v95_v28 = vmax.f32 %v87_v26, 0.0  ;;  %v89_v30 = vld [vmem:[#allocation2 + $0x38] sm:$0xff] }
  0x4f   :  { %428 = vmatprep.subr.bf16.mxu0 %v427_v8  ;;  %433 = vmatpush3.bf16.msra.mxu1 %v432_v15  ;;  %v86_v22 = vld [vmem:[#allocation2 + $0x20] sm:$0xff]  ;;  %v255_v23 = vmax.f32 %v254_v19, 0.0  ;;  %v96_v29 = vmax.f32 %v88_v27, 0.0  ;;  %v97_v31 = vmax.f32 %v89_v30, 0.0  ;;  %p545_p7 = por %p544_p6, %p543_p5 }
  0x50   :  { %434 = vmatprep.subr.bf16.mxu1 %v574_v0  ;;  %v94_v25 = vmax.f32 %v86_v22, 0.0  ;;  %v373_v48 = vld [vmem:[%s716_s5] ss:$0 sm:$0xff] }
  0x51   :  { %v372_v50 = vld [vmem:[%s714_s3] ss:$0 sm:$0xff]  ;;  %p546_p8 = pnand %p545_p7, %p539_p4 }
  0x52   :  { %430 = vmatpush3.bf16.msra.mxu0 %v427_v8 }
  0x53   :  { %436 = vmatpush3.bf16.msra.mxu1 %v435_v18 }
  0x55   :  { %401 = vmatmul.mubr.msk.f32.vlgmr.msra.gmra.mrb[0].mxu0 %vm102_vm1, %v91_v17 }
  0x56   :  { %403 = vmatprep.mubr.msk.f32.mxu0 %vm102_vm1, %v92_v20  ;;  %421 = vmatmul.mubr.msk.f32.vlgmr.msra.gmra.mrb[0].mxu1 %vm102_vm1, %v255_v23 }
  0x59   :  { %404 = vmatmul.mubr.msk.f32.gmra.mrb[2].mxu0 %vm102_vm1, %v93_v24 }
  0x5a   :  { %406 = vmatprep.mubr.msk.f32.mxu0 %vm102_vm1, %v94_v25 }
  0x5d   :  { %407 = vmatmul.mubr.msk.f32.gmra.mrb[4].mxu0 %vm102_vm1, %v95_v28 }
  0x5e   :  { %409 = vmatprep.mubr.msk.f32.mxu0 %vm102_vm1, %v96_v29 }
  0x61   :  { %410 = vmatmul.mubr.msk.f32.gmra.mrb[6].mxu0 %vm102_vm1, %v97_v31 }
 0x128   :  { %v402_v32 = vpop.f32.mrb[0].mxu0 }
 0x129   :  { %v193_v33 = vpop.f32.mrb[1].mxu0  ;;  %v336_v34 = vpop.f32.mrb[0].mxu1 }
 0x12a   :  { %v422_v36 = vpop.f32.mrb[1].mxu1  ;;  %v337_v51 = vadd.f32 %v373_v48, %v336_v34 }
 0x12c   :  { %v405_v35 = vpop.f32.mrb[2].mxu0 }
 0x12d   :  { %v203_v37 = vpop.f32.mrb[3].mxu0 }
 0x130   :  { %v408_v38 = vpop.f32.mrb[4].mxu0 }
 0x131   :  { %v233_v39 = vmax.f32 %v402_v32, %v408_v38  ;;  %v213_v40 = vpop.f32.mrb[5].mxu0 }
 0x132   :  { %v232_v41 = vmax.f32 %v193_v33, %v213_v40 }
 0x134   :  { %v236_v42 = vmax.f32 %v232_v41, %v233_v39  ;;  %v411_v43 = vpop.f32.mrb[6].mxu0 }
 0x135   :  { %v235_v44 = vmax.f32 %v405_v35, %v411_v43  ;;  %v223_v45 = vpop.f32.mrb[7].mxu0 }
 0x136   :  { %v234_v46 = vmax.f32 %v203_v37, %v223_v45 }
 0x138   :  { %v237_v47 = vmax.f32 %v234_v46, %v235_v44 }
 0x13a   :  { %v238_v49 = vmax.f32 %v236_v42, %v237_v47 }
 0x13c   :  { %v253_v52 = vadd.f32 %v372_v50, %v238_v49 }
 0x13e   :  { %v340_v53 = vadd.f32 %v337_v51, %v253_v52 }
 0x140   :  { %v341_v54 = vmul.f32 0.5, %v340_v53 }
 0x142   :  { %v342_v55 = vmul.f32 0.5, %v341_v54 }
 0x144   :  { %448 = vtanh.f32 %v342_v55 }
 0x14e   :  { %v449_v56 = vpop.eup %448 }
 0x14f   :  { %v344_v57 = vmul.f32 0.5, %v449_v56 }
 0x151   :  { %v345_v58 = vadd.f32 0.5, %v344_v57 }
 0x153   :  { %346 = vst [vmem:[#allocation10] sm:$0xff] %v345_v58 }
 0x154   :  { %549 = shalt.err (!%p546_p8)
}
 0x155   :  { %s550_s26 = scalar_lea.hbm %s717_s6, 128 }
 0x156   :  { %p551_p9 = scmp.ne.s32.totalorder %s717_s6, %s550_s26  ;;  %p554_p10 = scmp.lt.u32.totalorder %s550_s26, %s717_s6 }
 0x158   :  { %p556_p11 = pnand %p554_p10, %p551_p9 }
 0x15a   :  { %559 = shalt.err (!%p556_p11)
}
 0x15b   :  { %356 = dma.vmem_to_hbm [thread:$0]  %s354_s23, 128, %s717_s6, [#allocation4]  }
 0x15c   :  { %566 = dma.done.wait [#allocation4], 128  }
 0x15d   :  { %567 = vsyncadd [#allocation4], 4294967168 }
 0x15e   :  { %360 = vsyncpa [#allocation3], 1 }
 0x15f   :  { %361 = vsyncpa [#allocation6], 1 }
 0x160   :  { %362 = vsyncpa [#allocation9], 1 }
 0x161   :  { %363 = vsyncpa [#allocation4], 1 }

</bundles_post_ra>
